<compile_context>
chip_gen: v5e
topology: v5e:2x2
jax: 0.10.0
libtpu: 0.0.40
codegen_flags: <defaults>
</compile_context>

<pallas_src>
import functools
import math

import jax
import jax.numpy as jnp
from jax.experimental import pallas as pl
from jax.experimental.pallas import tpu as pltpu

LANES = 128
# ~4 MiB per block: amortizes per-grid-step overhead to ~5-12% even at v7x's
# 3.2 TB/s HBM.  in+out double-buffered => 16 MiB of pipeline buffers.
_BLOCK_BYTES = 4 * 1024 * 1024
# Explicitly raise scoped VMEM so 4 MiB blocks are safe on v5e (16 MiB default);
# this equals the v6e/v7x default, well under physical VMEM on all generations.
_VMEM_LIMIT_BYTES = 32 * 1024 * 1024
# Below this many elements XLA's fused elementwise chain beats any pallas_call
# (launch + reshape fixed costs dominate).
_MIN_PALLAS_ELEMS = 65536


def _make_ialaw_kernel(abs_max: float, a: float):
    const = abs_max / a
    z = 1.0 + math.log(a)
    inv_z = 1.0 / z
    inv_abs_max = 1.0 / abs_max
    scale_abs = abs_max != 1.0

    def kernel(y_ref, o_ref):
        # Math in f32 regardless of stored dtype; store back in original dtype.
        y = y_ref[...].astype(jnp.float32)
        y_abs = jnp.abs(y)
        if scale_abs:
            y_abs = y_abs * inv_abs_max       # mul by precomputed reciprocal
        y1 = z * y_abs
        y2 = jnp.exp(y1 - 1.0)
        mag = const * jnp.where(y_abs < inv_z, y1, y2)   # >= 0 always
        # copysign via sign-bit transplant (cheaper than sign(): no cmps/selects).
        # When y == 0 the magnitude is 0, so the transplanted sign is harmless.
        sign_bits = pltpu.bitcast(y, jnp.uint32) & jnp.uint32(0x80000000)
        x = pltpu.bitcast(pltpu.bitcast(mag, jnp.uint32) | sign_bits, jnp.float32)
        o_ref[...] = x.astype(o_ref.dtype)

    return kernel


def _ialaw_jnp(y, abs_max, a):
    """Pure-jnp path (tiny inputs / ragged tail). f32 math, original dtype out."""
    const = abs_max / a
    z = 1.0 + math.log(a)
    yf = y.astype(jnp.float32)
    y_abs = jnp.abs(yf) / abs_max
    y1 = z * y_abs
    y2 = jnp.exp(y1 - 1.0)
    x = const * jnp.sign(yf) * jnp.where(y_abs < 1.0 / z, y1, y2)
    return x.astype(y.dtype)


def _pallas_2d(y2d, abs_max, a):
    """Run the elementwise kernel over a lane-dense (rows, 128) slab."""
    rows = y2d.shape[0]
    itemsize = jnp.dtype(y2d.dtype).itemsize
    # Sublane-packing alignment: 8 rows for f32, 16 for bf16/f16, 32 for 8-bit.
    row_align = max(8, 32 // itemsize)
    max_tile_rows = max(
        row_align, (_BLOCK_BYTES // (LANES * itemsize)) // row_align * row_align
    )

    if rows <= row_align:
        tile_rows = rows                       # full-extent block: always legal
    else:
        # Even step count >= 4 whenever rows allow -> both v7x TensorCores get
        # a balanced, per-core double-buffered share (no-op on 1-TC chips).
        steps = max(4, pl.cdiv(rows, max_tile_rows))
        steps += steps % 2
        tile_rows = pl.cdiv(pl.cdiv(rows, steps), row_align) * row_align
        tile_rows = min(max(tile_rows, row_align), max_tile_rows)

    grid = (pl.cdiv(rows, tile_rows),)
    kernel = _make_ialaw_kernel(float(abs_max), float(a))

    return pl.pallas_call(
        kernel,
        out_shape=jax.ShapeDtypeStruct((rows, LANES), y2d.dtype),
        grid_spec=pltpu.PrefetchScalarGridSpec(
            num_scalar_prefetch=0,
            grid=grid,
            in_specs=[pl.BlockSpec((tile_rows, LANES), lambda i: (i, 0))],
            out_specs=pl.BlockSpec((tile_rows, LANES), lambda i: (i, 0)),
        ),
        compiler_params=pltpu.CompilerParams(
            dimension_semantics=("parallel",),
            vmem_limit_bytes=_VMEM_LIMIT_BYTES,
        ),
    )(y2d)


@functools.partial(jax.jit, static_argnames=("abs_max", "a", "min_pallas_size"))
def alaw_expansion(y: jax.Array, abs_max: float = 1.0, a: float = 87.6,
                   *, min_pallas_size: int = _MIN_PALLAS_ELEMS) -> jax.Array:
    """A-law expansion of an arbitrarily-shaped waveform tensor."""
    assert 0 < abs_max
    assert 1 <= a

    orig_shape = y.shape
    n = y.size
    if n == 0:
        return y
    if n < max(min_pallas_size, LANES):
        # Tiny input: fixed pallas_call costs dominate; XLA fuses this chain.
        return _ialaw_jnp(y, abs_max, a)

    y_flat = jnp.ravel(y)                      # free for contiguous input
    rows_main = n // LANES
    rem = n - rows_main * LANES

    if rem == 0:
        out2d = _pallas_2d(y_flat.reshape(rows_main, LANES), abs_max, a)
        return out2d.reshape(orig_shape)

    # Ragged tail: kernel on the lane-aligned prefix, tiny jnp epilogue for the
    # <=127-element tail, one concatenate stitch (no padded-garbage compute).
    # TODO(synk): a fully copy-free ragged path needs 1-D VMEM blocks or manual
    # DMA; not worth the complexity for a <128-element tail.
    n_main = rows_main * LANES
    out_main = _pallas_2d(
        y_flat[:n_main].reshape(rows_main, LANES), abs_max, a
    ).reshape(-1)
    out_tail = _ialaw_jnp(y_flat[n_main:], abs_max, a)
    return jnp.concatenate([out_main, out_tail]).reshape(orig_shape)


def _ref_alaw_expansion(y, abs_max=1.0, a=87.6):
    """Pure-JAX reference mirroring the PyTorch _forward exactly."""
    const = abs_max / a
    z = 1.0 + math.log(a)
    y_abs = jnp.abs(y) / abs_max
    y1 = z * y_abs
    y2 = jnp.exp(y1 - 1.0)
    return const * jnp.sign(y) * jnp.where(y_abs < 1.0 / z, y1, y2)


if __name__ == "__main__":
    key = jax.random.PRNGKey(0)
    k1, k2, k3 = jax.random.split(key, 3)

    # Small module-like waveform batch; force the Pallas path so the kernel runs.
    x = jax.random.uniform(k1, (2, 4, 16, 16), dtype=jnp.float32,
                           minval=-1.0, maxval=1.0)
    out = jax.block_until_ready(alaw_expansion(x, abs_max=1.0, a=87.6,
                                               min_pallas_size=0))
    ref = _ref_alaw_expansion(x, 1.0, 87.6)
    assert out.shape == x.shape and out.dtype == x.dtype
    assert jnp.allclose(out, ref, atol=1e-6, rtol=1e-5), "mismatch (aligned f32)"

    # Ragged (non-multiple-of-128) input with a non-unity abs_max.
    x2 = jax.random.uniform(k2, (3, 1000), dtype=jnp.float32,
                            minval=-2.0, maxval=2.0)
    out2 = jax.block_until_ready(alaw_expansion(x2, abs_max=2.0, a=87.6,
                                                min_pallas_size=0))
    ref2 = _ref_alaw_expansion(x2, 2.0, 87.6)
    assert jnp.allclose(out2, ref2, atol=1e-6, rtol=1e-5), "mismatch (ragged f32)"

    # bf16 input large enough to take the default heuristic path (>= 64K elems).
    x3 = jax.random.uniform(k3, (2, 200, 512), dtype=jnp.float32,
                            minval=-1.0, maxval=1.0).astype(jnp.bfloat16)
    out3 = jax.block_until_ready(alaw_expansion(x3))
    ref3 = _ref_alaw_expansion(x3.astype(jnp.float32), 1.0, 87.6).astype(jnp.bfloat16)
    assert out3.dtype == jnp.bfloat16 and out3.shape == x3.shape
    assert jnp.allclose(out3.astype(jnp.float32), ref3.astype(jnp.float32),
                        atol=2e-2, rtol=2e-2), "mismatch (bf16)"

    print("KERNEL_OK")
</pallas_src>

<mosaic_0001>
module attributes {stable_mosaic.version = 11 : i64} {
  func.func @kernel(%arg0: i32, %arg1: memref<8x128xf32, #tpu.memory_space<vmem>>, %arg2: memref<8x128xf32, #tpu.memory_space<vmem>>) attributes {dimension_semantics = [#tpu.dimension_semantics<parallel>], iteration_bounds = array<i64: 2>, scalar_prefetch = 0 : i64, scratch_operands = 0 : i64, tpu.core_type = #tpu.core_type<tc>, window_params = [{transform_indices = @transform_0, window_bounds = array<i64: 8, 128>}, {transform_indices = @transform_1, window_bounds = array<i64: 8, 128>}]} {
    %c0 = arith.constant 0 : index
    %c0_0 = arith.constant 0 : index
    %0 = vector.load %arg1[%c0, %c0_0] : memref<8x128xf32, #tpu.memory_space<vmem>>, vector<8x128xf32>
    %1 = math.absf %0 : vector<8x128xf32>
    %cst = arith.constant 5.47278118 : f32
    %2 = vector.broadcast %cst : f32 to vector<8x128xf32>
    %3 = arith.mulf %2, %1 : vector<8x128xf32>
    %cst_1 = arith.constant 1.000000e+00 : f32
    %4 = vector.broadcast %cst_1 : f32 to vector<8x128xf32>
    %5 = arith.subf %3, %4 : vector<8x128xf32>
    %6 = math.exp %5 : vector<8x128xf32>
    %cst_2 = arith.constant 0.182722464 : f32
    %7 = vector.broadcast %cst_2 : f32 to vector<8x128xf32>
    %8 = arith.cmpf olt, %1, %7 : vector<8x128xf32>
    %9 = arith.select %8, %3, %6 : vector<8x128xi1>, vector<8x128xf32>
    %cst_3 = arith.constant 0.0114155253 : f32
    %10 = vector.broadcast %cst_3 : f32 to vector<8x128xf32>
    %11 = arith.mulf %10, %9 : vector<8x128xf32>
    %12 = tpu.bitcast %0 : vector<8x128xf32> -> vector<8x128xi32>
    %c-2147483648_i32 = arith.constant -2147483648 : i32
    %13 = vector.broadcast %c-2147483648_i32 : i32 to vector<8x128xi32>
    %14 = arith.andi %12, %13 : vector<8x128xi32>
    %15 = tpu.bitcast %11 : vector<8x128xf32> -> vector<8x128xi32>
    %16 = arith.ori %15, %14 : vector<8x128xi32>
    %17 = tpu.bitcast %16 : vector<8x128xi32> -> vector<8x128xf32>
    %c0_4 = arith.constant 0 : index
    %c0_5 = arith.constant 0 : index
    %18 = vector.load %arg2[%c0_4, %c0_5] : memref<8x128xf32, #tpu.memory_space<vmem>>, vector<8x128xf32>
    tpu.vector_store %arg2[%c0_4, %c0_5], %17 {strides = array<i32>} : memref<8x128xf32, #tpu.memory_space<vmem>>, vector<8x128xf32>,
    return
  }
  func.func @transform_0(%arg0: i32) -> (i32, i32) {
    %c0_i32 = arith.constant 0 : i32
    %c0_i32_0 = arith.constant 0 : i32
    return %arg0, %c0_i32 : i32, i32
  }
  func.func @transform_1(%arg0: i32) -> (i32, i32) {
    %c0_i32 = arith.constant 0 : i32
    %c0_i32_0 = arith.constant 0 : i32
    return %arg0, %c0_i32 : i32, i32
  }
}

</mosaic_0001>

<bundles_post_ra>
// kernel: alaw_expansion.1
= control target key start
LH: loop header
LB: loop body
LE: loop exit
PB: predicated region body
PF: predicated region fallthrough
CT: control target
= control target key end

     0   :  { %s218_s6 = smov 0   ;;  %s229_s0 = inlined_call_operand.vmem [shape: f32[16,128], index: 0, kind: input, shape index: {}]   ;;  %s230_s1 = inlined_call_operand.vmem [shape: f32[16,128], index: 1, kind: output, shape index: {}]  }
   0x1 LB: > { %s180_s7 = sadd.s32 4294967295, %s206_s6   ;;  %p184_p0 = scmp.ge.s32.totalorder %s206_s6, 1  ;;  %s206_s6 = sphi %s218_s6, %s11_s6  }
   0x2   : > { %p86_p1 = scmp.lt.s32.totalorder %s206_s6, 3 }
   0x4   : > { %p87_p2 = pnand %p184_p0, %p86_p1 }
   0x5   : > { %p104_p3 = scmp.lt.s32.totalorder (!%p87_p2), %s180_s7, 1 }
   0x6   : > { %90 = sbr.rel (%p87_p2) target bundleno = 36 (0x24), region = 24 }
   0xb   : > { %s232_s7 = smov (!%p104_p3, %s180_s7), 1 }
   0xc   : > { %s185_s8 = sshll.u32 %s232_s7, 3 }
   0xd   : > { %s107_s11 = scalar_lea.vmem %s229_s0, %s185_s8  ;;  %s111_s14 = scalar_lea.vmem %s230_s1, %s185_s8 }
   0xe   : > { %v112_v0 = vld [vmem:[%s107_s11] sm:$0xff] }
   0xf   : > { %v113_v1 = vand.u32 2147483647, %v112_v0  ;;  %v122_v6 = vand.u32 2147483648, %v112_v0 }
  0x11   : > { %v114_v2 = vmul.f32 5.472781, %v113_v1  ;;  %vm118_vm0 = vcmp.lt.f32.partialorder %v113_v1, 0.18272246 }
  0x13   : > { %v187_v3 = vadd.f32 -1.0, %v114_v2 }
  0x15   : > { %v116_v4 = vmul.f32 1.442695, %v187_v3 }
  0x17   : > { %198 = vpow2.f32 %v116_v4 }
  0x1d   : > { %v199_v5 = vpop.eup %198 }
  0x1e   : > { %v119_v7 = vsel %vm118_vm0, %v114_v2, %v199_v5 }
  0x1f   : > { %v120_v8 = vmul.f32 0.011415525, %v119_v7 }
  0x21   : > { %v124_v9 = vor.u32 %v122_v6, %v120_v8 }
  0x23   : > { %126 = vst [vmem:[%s111_s14] sm:$0xff] %v124_v9 }
  0x24 PF: > { %s11_s6 = sadd.s32 1, %s206_s6  }
  0x25   : > { %p8_p4 = scmp.ge.s32.totalorder %s11_s6, 4  }
  0x27   :  { %10 = sbr.rel (!%p8_p4) target bundleno = 1 (0x1), region = 54 }

</bundles_post_ra>
